<compile_context>
chip_gen: v6e
topology: v6e:2x2x1
jax: 0.10.0
libtpu: 0.0.40
codegen_flags: <defaults>
</compile_context>

<pallas_src>
import functools

import jax
import jax.numpy as jnp
from jax import lax
from jax.experimental import pallas as pl
from jax.experimental.pallas import tpu as pltpu

_SQRT_HALF = 0.7071067811865476


def _gelu_exact(x):
    # PyTorch nn.GELU() default: exact erf-based GELU.
    return x * 0.5 * (1.0 + lax.erf(x * _SQRT_HALF))


def _round_up(x, m):
    return (x + m - 1) // m * m


def mlp_block_kernel(x_ref, w1_ref, b1_ref, w2_ref, b2_ref, o_ref, acc_ref):
    # x_ref:(tm,D) bf16, w1_ref:(D,th) bf16, b1_ref:(1,th) f32,
    # w2_ref:(th,D) bf16, b2_ref:(1,D) f32,
    # o_ref:(tm,D), acc_ref:(tm,D) f32 accumulator resident across the H axis.
    h_idx = pl.program_id(1)

    @pl.when(h_idx == 0)
    def _():
        acc_ref[...] = jnp.zeros_like(acc_ref)

    # First matmul (bf16 operands, f32 accumulate) + bias + GELU for this H tile.
    h = jnp.dot(x_ref[...], w1_ref[...], preferred_element_type=jnp.float32)
    h = _gelu_exact(h + b1_ref[...])

    # Second matmul: partial contraction over this hidden tile into the f32 acc.
    acc_ref[...] += jnp.dot(h.astype(w2_ref.dtype), w2_ref[...],
                            preferred_element_type=jnp.float32)

    # Final H step: add b2 exactly once and store the output tile.
    @pl.when(h_idx == pl.num_programs(1) - 1)
    def _():
        o_ref[...] = (acc_ref[...] + b2_ref[...]).astype(o_ref.dtype)


@functools.partial(jax.jit, static_argnames=("tm", "th", "compute_dtype"))
def _mlp_block_2d(x, w1, b1, w2, b2, *, tm=256, th=512,
                  compute_dtype=jnp.bfloat16):
    """y = GELU(x @ W1 + b1) @ W2 + b2 on flattened tokens x:[M, D].

    W1: [D, H], W2: [H, D], b1: [1, H], b2: [1, D]
    (weights stored transposed vs torch.nn.Linear's [out, in]).
    Dropout = identity (eval mode).
    """
    M, D = x.shape
    H = w1.shape[1]
    out_dtype = x.dtype

    # Lane-dense padding: last dims to multiples of 128.
    d_pad = _round_up(D, 128)
    h_pad = _round_up(H, 128)

    # Clamp tiles for small shapes, then pad so tiles divide evenly.
    tm = min(tm, _round_up(M, 8))
    th = min(th, h_pad)
    assert tm % 8 == 0 and th % 128 == 0
    m_pad = _round_up(M, tm)
    h_pad = _round_up(h_pad, th)

    cd = compute_dtype
    x_p = jnp.pad(x, ((0, m_pad - M), (0, d_pad - D))).astype(cd)
    w1_p = jnp.pad(w1, ((0, d_pad - D), (0, h_pad - H))).astype(cd)
    w2_p = jnp.pad(w2, ((0, h_pad - H), (0, d_pad - D))).astype(cd)
    # Biases stay f32 (added in f32 inside the kernel).
    b1_p = jnp.pad(b1, ((0, 0), (0, h_pad - H))).astype(jnp.float32)
    b2_p = jnp.pad(b2, ((0, 0), (0, d_pad - D))).astype(jnp.float32)

    grid = (m_pad // tm, h_pad // th)

    itm = jnp.dtype(cd).itemsize
    bytes_accessed = (
        (x_p.size + w1_p.size + w2_p.size) * itm
        + (b1_p.size + b2_p.size) * 4
        + m_pad * d_pad * jnp.dtype(out_dtype).itemsize)
    cost = pl.CostEstimate(
        flops=4 * m_pad * d_pad * h_pad,          # two matmuls
        transcendentals=m_pad * h_pad,            # erf per hidden element
        bytes_accessed=bytes_accessed)

    out = pl.pallas_call(
        mlp_block_kernel,
        out_shape=jax.ShapeDtypeStruct((m_pad, d_pad), out_dtype),
        grid_spec=pltpu.PrefetchScalarGridSpec(
            num_scalar_prefetch=0,
            grid=grid,
            in_specs=[
                pl.BlockSpec((tm, d_pad), lambda i, h: (i, 0)),   # x row tile
                pl.BlockSpec((d_pad, th), lambda i, h: (0, h)),   # W1 hidden tile
                pl.BlockSpec((1, th),     lambda i, h: (0, h)),   # b1 hidden tile
                pl.BlockSpec((th, d_pad), lambda i, h: (h, 0)),   # W2 hidden tile
                pl.BlockSpec((1, d_pad),  lambda i, h: (0, 0)),   # b2 (resident)
            ],
            out_specs=pl.BlockSpec((tm, d_pad), lambda i, h: (i, 0)),
            scratch_shapes=[pltpu.VMEM((tm, d_pad), jnp.float32)],
        ),
        compiler_params=pltpu.CompilerParams(
            dimension_semantics=("parallel", "arbitrary"),
            vmem_limit_bytes=64 * 1024 * 1024,
        ),
        cost_estimate=cost,
    )(x_p, w1_p, b1_p, w2_p, b2_p)

    return out[:M, :D]


def mlp_block(x, w1, b1, w2, b2, **kwargs):
    """Accepts x of shape [..., D]; flattens leading dims to tokens."""
    lead = x.shape[:-1]
    D = x.shape[-1]
    y = _mlp_block_2d(x.reshape(-1, D), w1, b1, w2, b2, **kwargs)
    return y.reshape(*lead, D)


def init_params(key, input_size, hidden_size, dtype=jnp.float32):
    # Mimic torch.nn.Linear default init: U(-1/sqrt(fan_in), 1/sqrt(fan_in)).
    k1, k2, k3, k4 = jax.random.split(key, 4)
    bound1 = 1.0 / jnp.sqrt(float(input_size))
    bound2 = 1.0 / jnp.sqrt(float(hidden_size))
    w1 = jax.random.uniform(k1, (input_size, hidden_size), dtype, -bound1, bound1)
    b1 = jax.random.uniform(k2, (1, hidden_size), dtype, -bound1, bound1)
    w2 = jax.random.uniform(k3, (hidden_size, input_size), dtype, -bound2, bound2)
    b2 = jax.random.uniform(k4, (1, input_size), dtype, -bound2, bound2)
    return w1, b1, w2, b2


def reference_mlp(x, w1, b1, w2, b2, compute_dtype=jnp.bfloat16):
    # Pure-JAX reference emulating the kernel's bf16-operand / f32-accumulate
    # path (biases added in f32).
    f32 = jnp.float32
    xc, w1c, w2c = (a.astype(compute_dtype).astype(f32) for a in (x, w1, w2))
    h = _gelu_exact(xc @ w1c + b1.astype(f32))
    h = h.astype(compute_dtype).astype(f32)
    return h @ w2c + b2.astype(f32)


if __name__ == "__main__":
    batch, seq = 2, 8
    input_size, hidden_size = 32, 64

    key = jax.random.PRNGKey(0)
    kx, kp = jax.random.split(key)

    # Input as [batch, seq, input_size]; wrapper flattens tokens internally.
    x = jax.random.normal(kx, (batch, seq, input_size), jnp.float32)
    w1, b1, w2, b2 = init_params(kp, input_size, hidden_size)

    out = mlp_block(x, w1, b1, w2, b2)
    jax.block_until_ready(out)

    ref = reference_mlp(x.reshape(-1, input_size), w1, b1, w2, b2)
    ref = ref.reshape(batch, seq, input_size)
    assert out.shape == (batch, seq, input_size)
    assert jnp.allclose(out, ref, atol=1e-3, rtol=1e-3), "mismatch vs reference"

    print("KERNEL_OK")
</pallas_src>

<mosaic_0001>
module attributes {stable_mosaic.version = 11 : i64} {
  func.func @mlp_block_kernel(%arg0: i32, %arg1: i32, %arg2: memref<16x128xbf16, #tpu.memory_space<vmem>>, %arg3: memref<128x128xbf16, #tpu.memory_space<vmem>>, %arg4: memref<1x128xf32, #tpu.memory_space<vmem>>, %arg5: memref<128x128xbf16, #tpu.memory_space<vmem>>, %arg6: memref<1x128xf32, #tpu.memory_space<vmem>>, %arg7: memref<16x128xf32, #tpu.memory_space<vmem>>, %arg8: memref<16x128xf32, #tpu.memory_space<vmem>>) attributes {dimension_semantics = [#tpu.dimension_semantics<parallel>, #tpu.dimension_semantics<arbitrary>], iteration_bounds = array<i64: 1, 1>, scalar_prefetch = 0 : i64, scratch_operands = 1 : i64, tpu.core_type = #tpu.core_type<tc>, window_params = [{transform_indices = @transform_0, window_bounds = array<i64: 16, 128>}, {transform_indices = @transform_1, window_bounds = array<i64: 128, 128>}, {transform_indices = @transform_2, window_bounds = array<i64: 1, 128>}, {transform_indices = @transform_3, window_bounds = array<i64: 128, 128>}, {pipeline_mode = #tpu.pipeline_mode<synchronous>, transform_indices = @transform_4, window_bounds = array<i64: 1, 128>}, {transform_indices = @transform_5, window_bounds = array<i64: 16, 128>}]} {
    %c0_i32 = arith.constant 0 : i32
    %0 = arith.cmpi eq, %arg1, %c0_i32 : i32
    %1 = arith.extui %0 : i1 to i32
    %c0_i32_0 = arith.constant 0 : i32
    %2 = arith.cmpi ne, %1, %c0_i32_0 : i32
    scf.if %2 {
      %cst_18 = arith.constant 0.000000e+00 : f32
      %26 = vector.broadcast %cst_18 : f32 to vector<16x128xf32>
      %c0_19 = arith.constant 0 : index
      %c0_20 = arith.constant 0 : index
      %27 = vector.load %arg8[%c0_19, %c0_20] : memref<16x128xf32, #tpu.memory_space<vmem>>, vector<16x128xf32>
      tpu.vector_store %arg8[%c0_19, %c0_20], %26 {strides = array<i32>} : memref<16x128xf32, #tpu.memory_space<vmem>>, vector<16x128xf32>,
    } else {
    }
    %c0 = arith.constant 0 : index
    %c0_1 = arith.constant 0 : index
    %3 = vector.load %arg2[%c0, %c0_1] : memref<16x128xbf16, #tpu.memory_space<vmem>>, vector<16x128xbf16>
    %c0_2 = arith.constant 0 : index
    %c0_3 = arith.constant 0 : index
    %4 = vector.load %arg3[%c0_2, %c0_3] : memref<128x128xbf16, #tpu.memory_space<vmem>>, vector<128x128xbf16>
    %cst = arith.constant dense<0.000000e+00> : vector<16x128xf32>
    %5 = tpu.matmul %3, %4, %cst {dimension_numbers = #tpu.dot_dimension_numbers<[1], [0], [0], [1], [0, 0, 1, 1], [], []>} : vector<16x128xbf16>, vector<128x128xbf16>, vector<16x128xf32> -> vector<16x128xf32>
    %c0_4 = arith.constant 0 : index
    %c0_5 = arith.constant 0 : index
    %6 = vector.load %arg4[%c0_4, %c0_5] : memref<1x128xf32, #tpu.memory_space<vmem>>, vector<1x128xf32>
    %7 = vector.broadcast %6 : vector<1x128xf32> to vector<16x128xf32>
    %8 = arith.addf %5, %7 : vector<16x128xf32>
    %cst_6 = arith.constant 5.000000e-01 : f32
    %9 = vector.broadcast %cst_6 : f32 to vector<16x128xf32>
    %10 = arith.mulf %8, %9 : vector<16x128xf32>
    %cst_7 = arith.constant 0.707106769 : f32
    %11 = vector.broadcast %cst_7 : f32 to vector<16x128xf32>
    %12 = arith.mulf %8, %11 : vector<16x128xf32>
    %13 = math.erf %12 : vector<16x128xf32>
    %cst_8 = arith.constant 1.000000e+00 : f32
    %14 = vector.broadcast %cst_8 : f32 to vector<16x128xf32>
    %15 = arith.addf %14, %13 : vector<16x128xf32>
    %16 = arith.mulf %10, %15 : vector<16x128xf32>
    %c0_9 = arith.constant 0 : index
    %c0_10 = arith.constant 0 : index
    %17 = vector.load %arg8[%c0_9, %c0_10] : memref<16x128xf32, #tpu.memory_space<vmem>>, vector<16x128xf32>
    %18 = arith.truncf %16 : vector<16x128xf32> to vector<16x128xbf16>
    %c0_11 = arith.constant 0 : index
    %c0_12 = arith.constant 0 : index
    %19 = vector.load %arg5[%c0_11, %c0_12] : memref<128x128xbf16, #tpu.memory_space<vmem>>, vector<128x128xbf16>
    %cst_13 = arith.constant dense<0.000000e+00> : vector<16x128xf32>
    %20 = tpu.matmul %18, %19, %cst_13 {dimension_numbers = #tpu.dot_dimension_numbers<[1], [0], [0], [1], [0, 0, 1, 1], [], []>} : vector<16x128xbf16>, vector<128x128xbf16>, vector<16x128xf32> -> vector<16x128xf32>
    %21 = arith.addf %17, %20 : vector<16x128xf32>
    %c0_14 = arith.constant 0 : index
    %c0_15 = arith.constant 0 : index
    %22 = vector.load %arg8[%c0_14, %c0_15] : memref<16x128xf32, #tpu.memory_space<vmem>>, vector<16x128xf32>
    tpu.vector_store %arg8[%c0_14, %c0_15], %21 {strides = array<i32>} : memref<16x128xf32, #tpu.memory_space<vmem>>, vector<16x128xf32>,
    %c0_i32_16 = arith.constant 0 : i32
    %23 = arith.cmpi eq, %arg1, %c0_i32_16 : i32
    %24 = arith.extui %23 : i1 to i32
    %c0_i32_17 = arith.constant 0 : i32
    %25 = arith.cmpi ne, %24, %c0_i32_17 : i32
    scf.if %25 {
      %c0_18 = arith.constant 0 : index
      %c0_19 = arith.constant 0 : index
      %26 = vector.load %arg8[%c0_18, %c0_19] : memref<16x128xf32, #tpu.memory_space<vmem>>, vector<16x128xf32>
      %c0_20 = arith.constant 0 : index
      %c0_21 = arith.constant 0 : index
      %27 = vector.load %arg6[%c0_20, %c0_21] : memref<1x128xf32, #tpu.memory_space<vmem>>, vector<1x128xf32>
      %28 = vector.broadcast %27 : vector<1x128xf32> to vector<16x128xf32>
      %29 = arith.addf %26, %28 : vector<16x128xf32>
      %c0_22 = arith.constant 0 : index
      %c0_23 = arith.constant 0 : index
      %30 = vector.load %arg7[%c0_22, %c0_23] : memref<16x128xf32, #tpu.memory_space<vmem>>, vector<16x128xf32>
      tpu.vector_store %arg7[%c0_22, %c0_23], %29 {strides = array<i32>} : memref<16x128xf32, #tpu.memory_space<vmem>>, vector<16x128xf32>,
    } else {
    }
    return
  }
  func.func @transform_0(%arg0: i32, %arg1: i32) -> (i32, i32) {
    %c0_i32 = arith.constant 0 : i32
    %c0_i32_0 = arith.constant 0 : i32
    return %arg0, %c0_i32 : i32, i32
  }
  func.func @transform_1(%arg0: i32, %arg1: i32) -> (i32, i32) {
    %c0_i32 = arith.constant 0 : i32
    %c0_i32_0 = arith.constant 0 : i32
    return %c0_i32, %arg1 : i32, i32
  }
  func.func @transform_2(%arg0: i32, %arg1: i32) -> (i32, i32) {
    %c0_i32 = arith.constant 0 : i32
    %c0_i32_0 = arith.constant 0 : i32
    return %c0_i32, %arg1 : i32, i32
  }
  func.func @transform_3(%arg0: i32, %arg1: i32) -> (i32, i32) {
    %c0_i32 = arith.constant 0 : i32
    %c0_i32_0 = arith.constant 0 : i32
    return %arg1, %c0_i32 : i32, i32
  }
  func.func @transform_4(%arg0: i32, %arg1: i32) -> (i32, i32) {
    %c0_i32 = arith.constant 0 : i32
    %c0_i32_0 = arith.constant 0 : i32
    %c0_i32_1 = arith.constant 0 : i32
    return %c0_i32, %c0_i32_0 : i32, i32
  }
  func.func @transform_5(%arg0: i32, %arg1: i32) -> (i32, i32) {
    %c0_i32 = arith.constant 0 : i32
    %c0_i32_0 = arith.constant 0 : i32
    return %arg0, %c0_i32 : i32, i32
  }
}

</mosaic_0001>

<bundles_post_ra>
// kernel: _mlp_block_2d.1
= control target key start
LH: loop header
LB: loop body
LE: loop exit
PB: predicated region body
PF: predicated region fallthrough
CT: control target
= control target key end

     0   :  { %v427_v1 = vmov 0.0   ;;  %vm428_vm0 = vmmov 0   ;;  %s522_s0 = inlined_call_operand.vmem [shape: bf16[16,128], index: 0, kind: input, shape index: {}]   ;;  %s523_s1 = inlined_call_operand.vmem [shape: bf16[128,128], index: 1, kind: input, shape index: {}]   ;;  %s524_s2 = inlined_call_operand.vmem [shape: f32[1,128], index: 2, kind: input, shape index: {}]   ;;  %s525_s3 = inlined_call_operand.vmem [shape: bf16[128,128], index: 3, kind: input, shape index: {}]   ;;  %s526_s4 = inlined_call_operand.vmem [shape: f32[1,128], index: 4, kind: input, shape index: {}]   ;;  %s527_s5 = inlined_call_operand.hbm [shape: f32[16,128], index: 5, kind: output, shape index: {}]  }
   0x1   :  { %v384_v0 = vld [vmem:[%s523_s1 + $0x38] sm:$0xff]   ;;  %339 = vmatprep.subr.bf16.mxu0 %v427_v1  ;;  %359 = vmatprep.subr.bf16.mxu1 %v427_v1  ;;  %v385_v2 = vld [vmem:[%s523_s1 + $0x30] sm:$0xff]   ;;  %v386_v3 = vld [vmem:[%s523_s1 + $0x28] sm:$0xff]  }
   0x2   :  { %340 = vmatpush3.bf16.msra.mxu0 %v384_v0  ;;  %355 = vmatprep.mubr.msk.bf16.mxu0 %vm428_vm0, %v427_v1  ;;  %v393_v4 = vld [vmem:[%s525_s3 + $0x38] sm:$0xff]   ;;  %v387_v5 = vld [vmem:[%s523_s1 + $0x20] sm:$0xff]  }
   0x3   :  { %341 = vmatprep.subr.bf16.mxu0 %v427_v1  ;;  %375 = vmatprep.mubr.msk.bf16.mxu1 %vm428_vm0, %v427_v1  ;;  %v388_v6 = vld [vmem:[%s523_s1 + $0x18] sm:$0xff]  }
   0x4   :  { %360 = vmatpush3.bf16.msra.mxu1 %v393_v4 }
   0x5   :  { %361 = vmatprep.subr.bf16.mxu1 %v427_v1 }
   0x6   :  { %342 = vmatpush3.bf16.msra.mxu0 %v385_v2 }
   0x7   :  { %343 = vmatprep.subr.bf16.mxu0 %v427_v1 }
   0xa   :  { %344 = vmatpush3.bf16.msra.mxu0 %v386_v3 }
   0xb   :  { %345 = vmatprep.subr.bf16.mxu0 %v427_v1 }
   0xe   :  { %346 = vmatpush3.bf16.msra.mxu0 %v387_v5 }
   0xf   :  { %347 = vmatprep.subr.bf16.mxu0 %v427_v1 }
  0x10   :  { %10 = vsyncpa [#allocation4], 0  ;;  %v389_v7 = vld [vmem:[%s523_s1 + $0x10] sm:$0xff]   ;;  %v390_v8 = vld [vmem:[%s523_s1 + $0x8] sm:$0xff]   ;;  %s429_s27 = smov [#allocation3]  }
  0x11   :  { %v391_v9 = vld [vmem:[%s523_s1] sm:$0xff]   ;;  %v394_v11 = vld [vmem:[%s525_s3 + $0x30] sm:$0xff]   ;;  %v395_v12 = vld [vmem:[%s525_s3 + $0x28] sm:$0xff]   ;;  %s291_s28 = sshll.u32 %s429_s27, 4  ;;  %s292_s28 = int_to_ptr.vmem [resolvable:$true] %s291_s28 }
  0x12   :  { %348 = vmatpush3.bf16.msra.mxu0 %v388_v6  ;;  %v392_v10 = vld [vmem:[%s522_s0] sm:$0xff]   ;;  %362 = vmatpush3.bf16.msra.mxu1 %v394_v11  ;;  %v397_v14 = vld [vmem:[%s525_s3 + $0x18] sm:$0xff]   ;;  %v398_v15 = vld [vmem:[%s525_s3 + $0x10] sm:$0xff]   ;;  %s405_s29 = scalar_lea.vmem %s292_s28, 256  ;;  %p410_p1 = scmp.lt.s32.totalorder %s292_s28, %s292_s28 }
  0x13   :  { %349 = vmatprep.subr.bf16.mxu0 %v427_v1  ;;  %363 = vmatprep.subr.bf16.mxu1 %v427_v1  ;;  %v396_v13 = vld [vmem:[%s525_s3 + $0x20] sm:$0xff]   ;;  %v399_v16 = vld [vmem:[%s525_s3 + $0x8] sm:$0xff]   ;;  %p406_p0 = scmp.ne.s32.totalorder %s292_s28, %s405_s29  ;;  %p411_p2 = scmp.lt.s32.totalorder %s405_s29, %s405_s29 }
  0x14   :  { %v400_v17 = vld [vmem:[%s525_s3] sm:$0xff]  }
  0x15   :  { %v302_v18 = vld [vmem:[%s524_s2] ss:$0 sm:$0xff]  ;;  %p412_p3 = por %p411_p2, %p410_p1 }
  0x16   :  { %350 = vmatpush3.bf16.msra.mxu0 %v389_v7  ;;  %364 = vmatpush3.bf16.msra.mxu1 %v395_v12  ;;  %v320_v36 = vld [vmem:[%s526_s4] ss:$0 sm:$0xff] }
  0x17   :  { %351 = vmatprep.subr.bf16.mxu0 %v427_v1  ;;  %365 = vmatprep.subr.bf16.mxu1 %v427_v1  ;;  %p413_p4 = pnand %p412_p3, %p406_p0 }
  0x1a   :  { %352 = vmatpush3.bf16.msra.mxu0 %v390_v8  ;;  %366 = vmatpush3.bf16.msra.mxu1 %v396_v13 }
  0x1b   :  { %353 = vmatprep.subr.bf16.mxu0 %v427_v1  ;;  %367 = vmatprep.subr.bf16.mxu1 %v427_v1 }
  0x1e   :  { %354 = vmatpush3.bf16.msra.mxu0 %v391_v9  ;;  %368 = vmatpush3.bf16.msra.mxu1 %v397_v14 }
  0x1f   :  { %369 = vmatprep.subr.bf16.mxu1 %v427_v1 }
  0x21   :  { %356 = vmatmul.mubr.bf16.vlgmr.msra.gmra.mxu0 %v392_v10 }
  0x22   :  { %370 = vmatpush3.bf16.msra.mxu1 %v398_v15 }
  0x23   :  { %371 = vmatprep.subr.bf16.mxu1 %v427_v1 }
  0x26   :  { %372 = vmatpush3.bf16.msra.mxu1 %v399_v16 }
  0x27   :  { %373 = vmatprep.subr.bf16.mxu1 %v427_v1 }
  0x2a   :  { %374 = vmatpush3.bf16.msra.mxu1 %v400_v17 }
  0xe1   :  { %v141_v19 = vpop.f32.mrf.mxu0 }
  0xe2   :  { %v142_v20 = vadd.f32 %v302_v18, %v141_v19 }
  0xe3   :  { %v357_v21 = vpop.f32.mrf.mxu0 }
  0xe4   :  { %v150_v22 = vmul.f32 0.70710677, %v142_v20  ;;  %v148_v30 = vmul.f32 0.5, %v142_v20 }
  0xe5   :  { %v144_v23 = vpop.f32.mrf.mxu0 }
  0xe6   :  { %401 = verf.f32 %v150_v22  ;;  %v145_v24 = vadd.f32 %v302_v18, %v144_v23 }
  0xe7   :  { %v358_v25 = vpop.f32.mrf.mxu0 }
  0xe8   :  { %v151_v26 = vmul.f32 0.70710677, %v145_v24  ;;  %v149_v31 = vmul.f32 0.5, %v145_v24 }
  0xea   :  { %403 = verf.f32 %v151_v26 }
  0xf3   :  { %v402_v27 = vpop.eup %401 }
  0xf4   :  { %v154_v28 = vadd.f32 1.0, %v402_v27 }
  0xf6   :  { %v156_v33 = vmul.f32 %v154_v28, %v148_v30 }
  0xf7   :  { %v404_v29 = vpop.eup %403 }
  0xf8   :  { %v155_v32 = vadd.f32 1.0, %v404_v29 }
  0xfa   :  { %v157_v34 = vmul.f32 %v155_v32, %v149_v31 }
  0xfc   :  { %v160_v35 = vpack.c.bf16 %v157_v34, %v156_v33 }
  0xfe   :  { %376 = vmatmul.mubr.bf16.vlgmr.msra.gmra.mxu1 %v160_v35 }
 0x1be   :  { %v259_v37 = vpop.f32.mrf.mxu1 }
 0x1bf   :  { %v282_v38 = vadd.f32 %v320_v36, %v259_v37 }
 0x1c0   :  { %v377_v39 = vpop.f32.mrf.mxu1 }
 0x1c1   :  { %284 = vst [vmem:[#allocation3] sm:$0xff] %v282_v38 }
 0x1c2   :  { %v262_v40 = vpop.f32.mrf.mxu1 }
 0x1c3   :  { %v283_v41 = vadd.f32 %v320_v36, %v262_v40 }
 0x1c4   :  { %v378_v42 = vpop.f32.mrf.mxu1 }
 0x1c5   :  { %285 = vst [vmem:[#allocation3 + $0x8] sm:$0xff] %v283_v41 }
 0x1c6   :  { %416 = shalt.err (!%p413_p4)
}
 0x1c7   :  { %s430_s30 = smov 128   ;;  %s431_s4 = smov 8  }
 0x1c8   :  { %297 = dma.vmem_to_hbm [thread:$0]  %s292_s28, 256, %s527_s5, [#allocation4], %s430_s30, %s430_s30, %s431_s4  }
 0x1c9   :  { %425 = dma.done.wait [#allocation4], 256  }
 0x1ca   :  { %426 = vsyncadd [#allocation4], 4294967040 }
 0x1cb   :  { %301 = vsyncpa [#allocation4], 1 }

</bundles_post_ra>
